<compile_context>
chip_gen: v7x
topology: tpu7x:2x2x1
jax: 0.10.0
libtpu: 0.0.40
codegen_flags: <defaults>
</compile_context>

<pallas_src>
import functools

import jax
import jax.numpy as jnp
from jax.experimental import pallas as pl
from jax.experimental.pallas import tpu as pltpu

_LN_EPS = 1e-5
_SQRT_HALF = 0.7071067811865476
_MAX_TK = 512            # K (gene-dim) tile; multiple of 128
_DEFAULT_BLOCK_ROWS = 128  # batch tile (use 256 on v6e/v7x for big batches)
_VMEM_LIMIT = 64 * 1024 * 1024  # fits v7x's 64 MiB physical VMEM


def _round_up(x, m):
    return (x + m - 1) // m * m


# ----------------------------------------------------------------------------
# Kernel bodies
# ----------------------------------------------------------------------------
def _head_epilogue(acc, b1, w2, b2, gamma, beta, p_real, compute_dtype):
    """Finish one Projection_Head given acc = x @ W1 (f32, lane-padded).

    Padded lanes of acc / b1 / w2 / b2 / gamma / beta are all zero, so `y`
    is exactly zero on padded lanes and LayerNorm statistics are taken over
    the first `p_real` lanes only.
    """
    proj = acc + b1                                              # Linear1 bias
    h = 0.5 * proj * (1.0 + jax.lax.erf(proj * _SQRT_HALF))      # exact GELU
    y = jnp.dot(h.astype(compute_dtype), w2,
                preferred_element_type=jnp.float32) + b2 + proj  # fc + residual
    # Masked LayerNorm over the real feature width.
    lane = jax.lax.broadcasted_iota(jnp.int32, y.shape, 1)
    valid = lane < p_real
    inv_n = 1.0 / float(p_real)
    mean = jnp.sum(y, axis=-1, keepdims=True) * inv_n            # pads are 0
    yc = jnp.where(valid, y - mean, 0.0)
    var = jnp.sum(yc * yc, axis=-1, keepdims=True) * inv_n
    yn = yc * jax.lax.rsqrt(var + _LN_EPS)
    return yn * gamma + beta


def _head_kernel(x_ref, w1_ref, b1_ref, w2_ref, b2_ref, g_ref, be_ref,
                 o_ref, acc_ref, *, p_real):
    """Single Projection_Head, K-tiled over the input feature dimension."""
    k = pl.program_id(1)

    @pl.when(k == 0)
    def _():
        acc_ref[...] = jnp.zeros_like(acc_ref)

    acc_ref[...] += jnp.dot(x_ref[...], w1_ref[...],
                            preferred_element_type=jnp.float32)

    @pl.when(k == pl.num_programs(1) - 1)
    def _():
        out = _head_epilogue(acc_ref[...], b1_ref[...], w2_ref[...],
                             b2_ref[...], g_ref[...], be_ref[...],
                             p_real, w2_ref.dtype)
        o_ref[...] = out.astype(o_ref.dtype)


def _two_head_kernel(x_ref,
                     w1a_ref, b1a_ref, w2a_ref, b2a_ref, ga_ref, bea_ref,
                     w1b_ref, b1b_ref, w2b_ref, b2b_ref, gb_ref, beb_ref,
                     o1_ref, o2_ref, acc_ref, *, p1_real, p2_real):
    """Fused model + projection_head for retrieval_parallel=True.

    The first head's output stays in VMEM/vregs and directly feeds the second
    head — no HBM round trip between the two Projection_Heads.
    """
    k = pl.program_id(1)

    @pl.when(k == 0)
    def _():
        acc_ref[...] = jnp.zeros_like(acc_ref)

    acc_ref[...] += jnp.dot(x_ref[...], w1a_ref[...],
                            preferred_element_type=jnp.float32)

    @pl.when(k == pl.num_programs(1) - 1)
    def _():
        cdt = w2a_ref.dtype
        out1 = _head_epilogue(acc_ref[...], b1a_ref[...], w2a_ref[...],
                              b2a_ref[...], ga_ref[...], bea_ref[...],
                              p1_real, cdt)
        o1_ref[...] = out1.astype(o1_ref.dtype)
        acc2 = jnp.dot(out1.astype(cdt), w1b_ref[...],
                       preferred_element_type=jnp.float32)
        out2 = _head_epilogue(acc2, b1b_ref[...], w2b_ref[...], b2b_ref[...],
                              gb_ref[...], beb_ref[...], p2_real, cdt)
        o2_ref[...] = out2.astype(o2_ref.dtype)


# ----------------------------------------------------------------------------
# Parameter / input padding helpers
# ----------------------------------------------------------------------------
def init_projection_head_params(key, embedding_dim, projection_dim):
    """nn.Linear-style init; weights stored as [in, out] (transposed vs torch)."""
    k1, k2, k3, k4 = jax.random.split(key, 4)
    lim1 = 1.0 / jnp.sqrt(embedding_dim)
    lim2 = 1.0 / jnp.sqrt(projection_dim)
    return {
        "w1": jax.random.uniform(k1, (embedding_dim, projection_dim),
                                 jnp.float32, -lim1, lim1),
        "b1": jax.random.uniform(k2, (projection_dim,), jnp.float32, -lim1, lim1),
        "w2": jax.random.uniform(k3, (projection_dim, projection_dim),
                                 jnp.float32, -lim2, lim2),
        "b2": jax.random.uniform(k4, (projection_dim,), jnp.float32, -lim2, lim2),
        "gamma": jnp.ones((projection_dim,), jnp.float32),
        "beta": jnp.zeros((projection_dim,), jnp.float32),
    }


def pad_projection_head_params(p, compute_dtype=jnp.float32, min_e_pad=None):
    """Zero-pad params to lane-dense widths and pick the K tile once."""
    e, p_out = p["w1"].shape
    p_pad = _round_up(p_out, 128)

    if min_e_pad is not None:
        assert min_e_pad >= e and min_e_pad % 128 == 0
        e_pad = min_e_pad
    elif e <= _MAX_TK:
        e_pad = e
    else:
        e_pad = _round_up(e, _MAX_TK)

    if e_pad <= _MAX_TK:
        tk = e_pad
    elif e_pad % _MAX_TK == 0:
        tk = _MAX_TK
    else:
        tk = 128  # e_pad is a multiple of 128 by construction

    dp = p_pad - p_out
    de = e_pad - e
    return {
        "w1": jnp.pad(p["w1"], ((0, de), (0, dp))).astype(compute_dtype),
        "w2": jnp.pad(p["w2"], ((0, dp), (0, dp))).astype(compute_dtype),
        "b1": jnp.pad(p["b1"], (0, dp)).reshape(1, p_pad).astype(jnp.float32),
        "b2": jnp.pad(p["b2"], (0, dp)).reshape(1, p_pad).astype(jnp.float32),
        "gamma": jnp.pad(p["gamma"], (0, dp)).reshape(1, p_pad).astype(jnp.float32),
        "beta": jnp.pad(p["beta"], (0, dp)).reshape(1, p_pad).astype(jnp.float32),
        "p_real": p_out,
        "e_real": e,
        "tk": tk,
    }


def _prep_x(x, e_real, e_pad, compute_dtype, block_rows):
    b = x.shape[0]
    tm = min(block_rows, _round_up(max(b, 1), 8))
    b_pad = _round_up(b, tm)
    x_p = jnp.pad(x, ((0, b_pad - b), (0, e_pad - e_real))).astype(compute_dtype)
    return x_p, tm, b_pad


_COMPILER_PARAMS = pltpu.CompilerParams(
    dimension_semantics=("parallel", "arbitrary"),
    vmem_limit_bytes=_VMEM_LIMIT,
)


# ----------------------------------------------------------------------------
# pallas_call wrappers
# ----------------------------------------------------------------------------
def projection_head_forward(x, pp, *, block_rows=_DEFAULT_BLOCK_ROWS,
                            out_dtype=jnp.float32):
    """One Projection_Head as a single fused Pallas kernel."""
    b, e = x.shape
    assert e == pp["e_real"]
    e_pad, p_pad = pp["w1"].shape
    tk = pp["tk"]
    p_real = pp["p_real"]

    x_p, tm, b_pad = _prep_x(x, e, e_pad, pp["w1"].dtype, block_rows)
    grid = (b_pad // tm, e_pad // tk)
    const = lambda i, k: (0, 0)

    out = pl.pallas_call(
        functools.partial(_head_kernel, p_real=p_real),
        out_shape=jax.ShapeDtypeStruct((b_pad, p_pad), out_dtype),
        grid_spec=pltpu.PrefetchScalarGridSpec(
            num_scalar_prefetch=0,
            grid=grid,
            in_specs=[
                pl.BlockSpec((tm, tk), lambda i, k: (i, k)),       # x tile
                pl.BlockSpec((tk, p_pad), lambda i, k: (k, 0)),    # W1 K-slice
                pl.BlockSpec((1, p_pad), const),                   # b1
                pl.BlockSpec((p_pad, p_pad), const),               # W2
                pl.BlockSpec((1, p_pad), const),                   # b2
                pl.BlockSpec((1, p_pad), const),                   # gamma
                pl.BlockSpec((1, p_pad), const),                   # beta
            ],
            out_specs=pl.BlockSpec((tm, p_pad), lambda i, k: (i, 0)),
            scratch_shapes=[pltpu.VMEM((tm, p_pad), jnp.float32)],
        ),
        compiler_params=_COMPILER_PARAMS,
    )(x_p, pp["w1"], pp["b1"], pp["w2"], pp["b2"], pp["gamma"], pp["beta"])
    return out[:b, :p_real]


def gene_encoder_fused_forward(x, model_pp, head_pp, *,
                               block_rows=_DEFAULT_BLOCK_ROWS,
                               out_dtype=jnp.float32):
    """retrieval_parallel path: both Projection_Heads in one pallas_call."""
    b, e = x.shape
    assert e == model_pp["e_real"]
    e_pad, p1_pad = model_pp["w1"].shape
    p2_pad = head_pp["w1"].shape[1]
    assert head_pp["w1"].shape[0] == p1_pad, "head params not padded to model width"
    tk = model_pp["tk"]

    x_p, tm, b_pad = _prep_x(x, e, e_pad, model_pp["w1"].dtype, block_rows)
    grid = (b_pad // tm, e_pad // tk)
    const = lambda i, k: (0, 0)

    out1, out2 = pl.pallas_call(
        functools.partial(_two_head_kernel,
                          p1_real=model_pp["p_real"],
                          p2_real=head_pp["p_real"]),
        out_shape=(jax.ShapeDtypeStruct((b_pad, p1_pad), out_dtype),
                   jax.ShapeDtypeStruct((b_pad, p2_pad), out_dtype)),
        grid_spec=pltpu.PrefetchScalarGridSpec(
            num_scalar_prefetch=0,
            grid=grid,
            in_specs=[
                pl.BlockSpec((tm, tk), lambda i, k: (i, k)),       # x tile
                pl.BlockSpec((tk, p1_pad), lambda i, k: (k, 0)),   # W1a K-slice
                pl.BlockSpec((1, p1_pad), const),                  # b1a
                pl.BlockSpec((p1_pad, p1_pad), const),             # W2a
                pl.BlockSpec((1, p1_pad), const),                  # b2a
                pl.BlockSpec((1, p1_pad), const),                  # gamma a
                pl.BlockSpec((1, p1_pad), const),                  # beta a
                pl.BlockSpec((p1_pad, p2_pad), const),             # W1b
                pl.BlockSpec((1, p2_pad), const),                  # b1b
                pl.BlockSpec((p2_pad, p2_pad), const),             # W2b
                pl.BlockSpec((1, p2_pad), const),                  # b2b
                pl.BlockSpec((1, p2_pad), const),                  # gamma b
                pl.BlockSpec((1, p2_pad), const),                  # beta b
            ],
            out_specs=(pl.BlockSpec((tm, p1_pad), lambda i, k: (i, 0)),
                       pl.BlockSpec((tm, p2_pad), lambda i, k: (i, 0))),
            scratch_shapes=[pltpu.VMEM((tm, p1_pad), jnp.float32)],
        ),
        compiler_params=_COMPILER_PARAMS,
    )(x_p,
      model_pp["w1"], model_pp["b1"], model_pp["w2"], model_pp["b2"],
      model_pp["gamma"], model_pp["beta"],
      head_pp["w1"], head_pp["b1"], head_pp["w2"], head_pp["b2"],
      head_pp["gamma"], head_pp["beta"])
    return out1[:b, :model_pp["p_real"]], out2[:b, :head_pp["p_real"]]


# ----------------------------------------------------------------------------
# Module wrapper
# ----------------------------------------------------------------------------
class GeneEncoderMLP:
    """GeneEncoder(model_name='MLP'): both Projection_Heads as Pallas kernels."""

    def __init__(self, input_gene_dimension, output_dimension,
                 latent_embedding_dimension, key, compute_dtype=jnp.float32):
        k_model, k_head = jax.random.split(key)
        self.model_params = init_projection_head_params(
            k_model, input_gene_dimension, output_dimension)
        self.head_params = init_projection_head_params(
            k_head, output_dimension, latent_embedding_dimension)
        p1_pad = _round_up(output_dimension, 128)
        self.model_params_padded = pad_projection_head_params(
            self.model_params, compute_dtype)
        # Head input dim padded to the model's padded output width so the
        # fused kernel can feed model(x) straight into the head in VMEM.
        self.head_params_padded = pad_projection_head_params(
            self.head_params, compute_dtype, min_e_pad=p1_pad)

    def forward(self, x, retrieval_parallel=False):
        if retrieval_parallel:
            return gene_encoder_fused_forward(
                x, self.model_params_padded, self.head_params_padded)
        return projection_head_forward(x, self.model_params_padded)

    def forward_head(self, x):
        return projection_head_forward(x, self.head_params_padded)


# ----------------------------------------------------------------------------
# Plain-JAX reference
# ----------------------------------------------------------------------------
def _reference_projection_head(x, p, compute_dtype=jnp.float32):
    xc = x.astype(compute_dtype)
    proj = jnp.dot(xc, p["w1"].astype(compute_dtype),
                   preferred_element_type=jnp.float32) + p["b1"]
    h = 0.5 * proj * (1.0 + jax.lax.erf(proj * _SQRT_HALF))
    y = jnp.dot(h.astype(compute_dtype), p["w2"].astype(compute_dtype),
                preferred_element_type=jnp.float32) + p["b2"] + proj
    mean = jnp.mean(y, axis=-1, keepdims=True)
    var = jnp.mean((y - mean) ** 2, axis=-1, keepdims=True)
    return (y - mean) * jax.lax.rsqrt(var + _LN_EPS) * p["gamma"] + p["beta"]


if __name__ == "__main__":
    key = jax.random.PRNGKey(0)
    k_x, k_params = jax.random.split(key)

    B = 8                          # cells
    input_gene_dimension = 32      # genes per cell
    output_dimension = 64          # encoder output dim
    latent_embedding_dimension = 16

    x = jax.random.normal(k_x, (B, input_gene_dimension), jnp.float32)

    # ---- f32 weights ---------------------------------------------------
    enc = GeneEncoderMLP(input_gene_dimension, output_dimension,
                         latent_embedding_dimension, k_params)

    model_out, head_out = enc.forward(x, retrieval_parallel=True)  # fused kernel
    jax.block_until_ready((model_out, head_out))

    model_only = enc.forward(x)                                    # single head
    head_only = enc.forward_head(model_only)
    jax.block_until_ready((model_only, head_only))

    ref_model = _reference_projection_head(x, enc.model_params)
    ref_head = _reference_projection_head(ref_model, enc.head_params)

    assert model_out.shape == (B, output_dimension)
    assert head_out.shape == (B, latent_embedding_dimension)
    assert jnp.allclose(model_out, ref_model, atol=1e-4, rtol=1e-4)
    assert jnp.allclose(head_out, ref_head, atol=1e-4, rtol=1e-4)
    assert jnp.allclose(model_only, ref_model, atol=1e-4, rtol=1e-4)
    assert jnp.allclose(head_only, ref_head, atol=1e-4, rtol=1e-4)

    # ---- bf16 storage / bf16 MXU matmuls, f32 accumulation + epilogue ---
    enc_bf16 = GeneEncoderMLP(input_gene_dimension, output_dimension,
                              latent_embedding_dimension, k_params,
                              compute_dtype=jnp.bfloat16)
    m_bf16, h_bf16 = enc_bf16.forward(x, retrieval_parallel=True)
    jax.block_until_ready((m_bf16, h_bf16))
    ref_m_bf16 = _reference_projection_head(x, enc.model_params, jnp.bfloat16)
    ref_h_bf16 = _reference_projection_head(ref_m_bf16, enc.head_params,
                                            jnp.bfloat16)
    assert jnp.allclose(m_bf16, ref_m_bf16, atol=5e-2, rtol=5e-2)
    assert jnp.allclose(h_bf16, ref_h_bf16, atol=5e-2, rtol=5e-2)

    print("KERNEL_OK")
</pallas_src>

<mosaic_0001>
module attributes {stable_mosaic.version = 11 : i64} {
  func.func @_two_head_kernel(%arg0: i32, %arg1: i32, %arg2: memref<8x32xf32, #tpu.memory_space<vmem>>, %arg3: memref<32x128xf32, #tpu.memory_space<vmem>>, %arg4: memref<1x128xf32, #tpu.memory_space<vmem>>, %arg5: memref<128x128xf32, #tpu.memory_space<vmem>>, %arg6: memref<1x128xf32, #tpu.memory_space<vmem>>, %arg7: memref<1x128xf32, #tpu.memory_space<vmem>>, %arg8: memref<1x128xf32, #tpu.memory_space<vmem>>, %arg9: memref<128x128xf32, #tpu.memory_space<vmem>>, %arg10: memref<1x128xf32, #tpu.memory_space<vmem>>, %arg11: memref<128x128xf32, #tpu.memory_space<vmem>>, %arg12: memref<1x128xf32, #tpu.memory_space<vmem>>, %arg13: memref<1x128xf32, #tpu.memory_space<vmem>>, %arg14: memref<1x128xf32, #tpu.memory_space<vmem>>, %arg15: memref<8x128xf32, #tpu.memory_space<vmem>>, %arg16: memref<8x128xf32, #tpu.memory_space<vmem>>, %arg17: memref<8x128xf32, #tpu.memory_space<vmem>>) attributes {dimension_semantics = [#tpu.dimension_semantics<parallel>, #tpu.dimension_semantics<arbitrary>], iteration_bounds = array<i64: 1, 1>, scalar_prefetch = 0 : i64, scratch_operands = 1 : i64, tpu.core_type = #tpu.core_type<tc>, window_params = [{transform_indices = @transform_0, window_bounds = array<i64: 8, 32>}, {transform_indices = @transform_1, window_bounds = array<i64: 32, 128>}, {pipeline_mode = #tpu.pipeline_mode<synchronous>, transform_indices = @transform_2, window_bounds = array<i64: 1, 128>}, {pipeline_mode = #tpu.pipeline_mode<synchronous>, transform_indices = @transform_3, window_bounds = array<i64: 128, 128>}, {pipeline_mode = #tpu.pipeline_mode<synchronous>, transform_indices = @transform_4, window_bounds = array<i64: 1, 128>}, {pipeline_mode = #tpu.pipeline_mode<synchronous>, transform_indices = @transform_5, window_bounds = array<i64: 1, 128>}, {pipeline_mode = #tpu.pipeline_mode<synchronous>, transform_indices = @transform_6, window_bounds = array<i64: 1, 128>}, {pipeline_mode = #tpu.pipeline_mode<synchronous>, transform_indices = @transform_7, window_bounds = array<i64: 128, 128>}, {pipeline_mode = #tpu.pipeline_mode<synchronous>, transform_indices = @transform_8, window_bounds = array<i64: 1, 128>}, {pipeline_mode = #tpu.pipeline_mode<synchronous>, transform_indices = @transform_9, window_bounds = array<i64: 128, 128>}, {pipeline_mode = #tpu.pipeline_mode<synchronous>, transform_indices = @transform_10, window_bounds = array<i64: 1, 128>}, {pipeline_mode = #tpu.pipeline_mode<synchronous>, transform_indices = @transform_11, window_bounds = array<i64: 1, 128>}, {pipeline_mode = #tpu.pipeline_mode<synchronous>, transform_indices = @transform_12, window_bounds = array<i64: 1, 128>}, {transform_indices = @transform_13, window_bounds = array<i64: 8, 128>}, {transform_indices = @transform_14, window_bounds = array<i64: 8, 128>}]} {
    %c0_i32 = arith.constant 0 : i32
    %0 = arith.cmpi eq, %arg1, %c0_i32 : i32
    %1 = arith.extui %0 : i1 to i32
    %c0_i32_0 = arith.constant 0 : i32
    %2 = arith.cmpi ne, %1, %c0_i32_0 : i32
    scf.if %2 {
      %cst_10 = arith.constant 0.000000e+00 : f32
      %12 = vector.broadcast %cst_10 : f32 to vector<8x128xf32>
      %c0_11 = arith.constant 0 : index
      %c0_12 = arith.constant 0 : index
      %13 = vector.load %arg17[%c0_11, %c0_12] : memref<8x128xf32, #tpu.memory_space<vmem>>, vector<8x128xf32>
      tpu.vector_store %arg17[%c0_11, %c0_12], %12 {strides = array<i32>} : memref<8x128xf32, #tpu.memory_space<vmem>>, vector<8x128xf32>,
    } else {
    }
    %c0 = arith.constant 0 : index
    %c0_1 = arith.constant 0 : index
    %3 = vector.load %arg17[%c0, %c0_1] : memref<8x128xf32, #tpu.memory_space<vmem>>, vector<8x128xf32>
    %c0_2 = arith.constant 0 : index
    %c0_3 = arith.constant 0 : index
    %4 = vector.load %arg2[%c0_2, %c0_3] : memref<8x32xf32, #tpu.memory_space<vmem>>, vector<8x32xf32>
    %c0_4 = arith.constant 0 : index
    %c0_5 = arith.constant 0 : index
    %5 = vector.load %arg3[%c0_4, %c0_5] : memref<32x128xf32, #tpu.memory_space<vmem>>, vector<32x128xf32>
    %cst = arith.constant dense<0.000000e+00> : vector<8x128xf32>
    %6 = tpu.matmul %4, %5, %cst {dimension_numbers = #tpu.dot_dimension_numbers<[1], [0], [0], [1], [0, 0, 1, 1], [], []>} : vector<8x32xf32>, vector<32x128xf32>, vector<8x128xf32> -> vector<8x128xf32>
    %7 = arith.addf %3, %6 : vector<8x128xf32>
    %c0_6 = arith.constant 0 : index
    %c0_7 = arith.constant 0 : index
    %8 = vector.load %arg17[%c0_6, %c0_7] : memref<8x128xf32, #tpu.memory_space<vmem>>, vector<8x128xf32>
    tpu.vector_store %arg17[%c0_6, %c0_7], %7 {strides = array<i32>} : memref<8x128xf32, #tpu.memory_space<vmem>>, vector<8x128xf32>,
    %c0_i32_8 = arith.constant 0 : i32
    %9 = arith.cmpi eq, %arg1, %c0_i32_8 : i32
    %10 = arith.extui %9 : i1 to i32
    %c0_i32_9 = arith.constant 0 : i32
    %11 = arith.cmpi ne, %10, %c0_i32_9 : i32
    scf.if %11 {
      %c0_10 = arith.constant 0 : index
      %c0_11 = arith.constant 0 : index
      %12 = vector.load %arg17[%c0_10, %c0_11] : memref<8x128xf32, #tpu.memory_space<vmem>>, vector<8x128xf32>
      %c0_12 = arith.constant 0 : index
      %c0_13 = arith.constant 0 : index
      %13 = vector.load %arg4[%c0_12, %c0_13] : memref<1x128xf32, #tpu.memory_space<vmem>>, vector<1x128xf32>
      %c0_14 = arith.constant 0 : index
      %c0_15 = arith.constant 0 : index
      %14 = vector.load %arg5[%c0_14, %c0_15] : memref<128x128xf32, #tpu.memory_space<vmem>>, vector<128x128xf32>
      %c0_16 = arith.constant 0 : index
      %c0_17 = arith.constant 0 : index
      %15 = vector.load %arg6[%c0_16, %c0_17] : memref<1x128xf32, #tpu.memory_space<vmem>>, vector<1x128xf32>
      %c0_18 = arith.constant 0 : index
      %c0_19 = arith.constant 0 : index
      %16 = vector.load %arg7[%c0_18, %c0_19] : memref<1x128xf32, #tpu.memory_space<vmem>>, vector<1x128xf32>
      %c0_20 = arith.constant 0 : index
      %c0_21 = arith.constant 0 : index
      %17 = vector.load %arg8[%c0_20, %c0_21] : memref<1x128xf32, #tpu.memory_space<vmem>>, vector<1x128xf32>
      %18 = vector.broadcast %13 : vector<1x128xf32> to vector<8x128xf32>
      %19 = arith.addf %12, %18 : vector<8x128xf32>
      %cst_22 = arith.constant 5.000000e-01 : f32
      %20 = vector.broadcast %cst_22 : f32 to vector<8x128xf32>
      %21 = arith.mulf %20, %19 : vector<8x128xf32>
      %cst_23 = arith.constant 0.707106769 : f32
      %22 = vector.broadcast %cst_23 : f32 to vector<8x128xf32>
      %23 = arith.mulf %19, %22 : vector<8x128xf32>
      %24 = math.erf %23 : vector<8x128xf32>
      %cst_24 = arith.constant 1.000000e+00 : f32
      %25 = vector.broadcast %cst_24 : f32 to vector<8x128xf32>
      %26 = arith.addf %25, %24 : vector<8x128xf32>
      %27 = arith.mulf %21, %26 : vector<8x128xf32>
      %cst_25 = arith.constant dense<0.000000e+00> : vector<8x128xf32>
      %28 = tpu.matmul %27, %14, %cst_25 {dimension_numbers = #tpu.dot_dimension_numbers<[1], [0], [0], [1], [0, 0, 1, 1], [], []>} : vector<8x128xf32>, vector<128x128xf32>, vector<8x128xf32> -> vector<8x128xf32>
      %29 = vector.broadcast %15 : vector<1x128xf32> to vector<8x128xf32>
      %30 = arith.addf %28, %29 : vector<8x128xf32>
      %31 = arith.addf %30, %19 : vector<8x128xf32>
      %32 = tpu.iota {dimensions = array<i32: 1>} : vector<8x128xi32>
      %c64_i32 = arith.constant 64 : i32
      %33 = vector.broadcast %c64_i32 : i32 to vector<8x128xi32>
      %34 = arith.cmpi slt, %32, %33 : vector<8x128xi32>
      %cst_26 = arith.constant dense<0.000000e+00> : vector<8xf32>
      %35 = vector.multi_reduction <add>, %31, %cst_26 [1] : vector<8x128xf32> to vector<8xf32>
      %36 = vector.shape_cast %35 : vector<8xf32> to vector<8x1xf32>
      %cst_27 = arith.constant 1.562500e-02 : f32
      %37 = vector.broadcast %cst_27 : f32 to vector<8x1xf32>
      %38 = arith.mulf %36, %37 : vector<8x1xf32>
      %39 = vector.broadcast %38 : vector<8x1xf32> to vector<8x128xf32>
      %40 = arith.subf %31, %39 : vector<8x128xf32>
      %cst_28 = arith.constant 0.000000e+00 : f32
      %41 = vector.broadcast %cst_28 : f32 to vector<8x128xf32>
      %42 = arith.select %34, %40, %41 : vector<8x128xi1>, vector<8x128xf32>
      %43 = arith.mulf %42, %42 : vector<8x128xf32>
      %cst_29 = arith.constant dense<0.000000e+00> : vector<8xf32>
      %44 = vector.multi_reduction <add>, %43, %cst_29 [1] : vector<8x128xf32> to vector<8xf32>
      %45 = vector.shape_cast %44 : vector<8xf32> to vector<8x1xf32>
      %cst_30 = arith.constant 1.562500e-02 : f32
      %46 = vector.broadcast %cst_30 : f32 to vector<8x1xf32>
      %47 = arith.mulf %45, %46 : vector<8x1xf32>
      %cst_31 = arith.constant 9.99999974E-6 : f32
      %48 = vector.broadcast %cst_31 : f32 to vector<8x1xf32>
      %49 = arith.addf %47, %48 : vector<8x1xf32>
      %50 = math.rsqrt %49 : vector<8x1xf32>
      %51 = vector.broadcast %50 : vector<8x1xf32> to vector<8x128xf32>
      %52 = arith.mulf %42, %51 : vector<8x128xf32>
      %53 = vector.broadcast %16 : vector<1x128xf32> to vector<8x128xf32>
      %54 = arith.mulf %52, %53 : vector<8x128xf32>
      %55 = vector.broadcast %17 : vector<1x128xf32> to vector<8x128xf32>
      %56 = arith.addf %54, %55 : vector<8x128xf32>
      %c0_32 = arith.constant 0 : index
      %c0_33 = arith.constant 0 : index
      %57 = vector.load %arg15[%c0_32, %c0_33] : memref<8x128xf32, #tpu.memory_space<vmem>>, vector<8x128xf32>
      tpu.vector_store %arg15[%c0_32, %c0_33], %56 {strides = array<i32>} : memref<8x128xf32, #tpu.memory_space<vmem>>, vector<8x128xf32>,
      %c0_34 = arith.constant 0 : index
      %c0_35 = arith.constant 0 : index
      %58 = vector.load %arg9[%c0_34, %c0_35] : memref<128x128xf32, #tpu.memory_space<vmem>>, vector<128x128xf32>
      %cst_36 = arith.constant dense<0.000000e+00> : vector<8x128xf32>
      %59 = tpu.matmul %56, %58, %cst_36 {dimension_numbers = #tpu.dot_dimension_numbers<[1], [0], [0], [1], [0, 0, 1, 1], [], []>} : vector<8x128xf32>, vector<128x128xf32>, vector<8x128xf32> -> vector<8x128xf32>
      %c0_37 = arith.constant 0 : index
      %c0_38 = arith.constant 0 : index
      %60 = vector.load %arg10[%c0_37, %c0_38] : memref<1x128xf32, #tpu.memory_space<vmem>>, vector<1x128xf32>
      %c0_39 = arith.constant 0 : index
      %c0_40 = arith.constant 0 : index
      %61 = vector.load %arg11[%c0_39, %c0_40] : memref<128x128xf32, #tpu.memory_space<vmem>>, vector<128x128xf32>
      %c0_41 = arith.constant 0 : index
      %c0_42 = arith.constant 0 : index
      %62 = vector.load %arg12[%c0_41, %c0_42] : memref<1x128xf32, #tpu.memory_space<vmem>>, vector<1x128xf32>
      %c0_43 = arith.constant 0 : index
      %c0_44 = arith.constant 0 : index
      %63 = vector.load %arg13[%c0_43, %c0_44] : memref<1x128xf32, #tpu.memory_space<vmem>>, vector<1x128xf32>
      %c0_45 = arith.constant 0 : index
      %c0_46 = arith.constant 0 : index
      %64 = vector.load %arg14[%c0_45, %c0_46] : memref<1x128xf32, #tpu.memory_space<vmem>>, vector<1x128xf32>
      %65 = vector.broadcast %60 : vector<1x128xf32> to vector<8x128xf32>
      %66 = arith.addf %59, %65 : vector<8x128xf32>
      %cst_47 = arith.constant 5.000000e-01 : f32
      %67 = vector.broadcast %cst_47 : f32 to vector<8x128xf32>
      %68 = arith.mulf %67, %66 : vector<8x128xf32>
      %cst_48 = arith.constant 0.707106769 : f32
      %69 = vector.broadcast %cst_48 : f32 to vector<8x128xf32>
      %70 = arith.mulf %66, %69 : vector<8x128xf32>
      %71 = math.erf %70 : vector<8x128xf32>
      %cst_49 = arith.constant 1.000000e+00 : f32
      %72 = vector.broadcast %cst_49 : f32 to vector<8x128xf32>
      %73 = arith.addf %72, %71 : vector<8x128xf32>
      %74 = arith.mulf %68, %73 : vector<8x128xf32>
      %cst_50 = arith.constant dense<0.000000e+00> : vector<8x128xf32>
      %75 = tpu.matmul %74, %61, %cst_50 {dimension_numbers = #tpu.dot_dimension_numbers<[1], [0], [0], [1], [0, 0, 1, 1], [], []>} : vector<8x128xf32>, vector<128x128xf32>, vector<8x128xf32> -> vector<8x128xf32>
      %76 = vector.broadcast %62 : vector<1x128xf32> to vector<8x128xf32>
      %77 = arith.addf %75, %76 : vector<8x128xf32>
      %78 = arith.addf %77, %66 : vector<8x128xf32>
      %79 = tpu.iota {dimensions = array<i32: 1>} : vector<8x128xi32>
      %c16_i32 = arith.constant 16 : i32
      %80 = vector.broadcast %c16_i32 : i32 to vector<8x128xi32>
      %81 = arith.cmpi slt, %79, %80 : vector<8x128xi32>
      %cst_51 = arith.constant dense<0.000000e+00> : vector<8xf32>
      %82 = vector.multi_reduction <add>, %78, %cst_51 [1] : vector<8x128xf32> to vector<8xf32>
      %83 = vector.shape_cast %82 : vector<8xf32> to vector<8x1xf32>
      %cst_52 = arith.constant 6.250000e-02 : f32
      %84 = vector.broadcast %cst_52 : f32 to vector<8x1xf32>
      %85 = arith.mulf %83, %84 : vector<8x1xf32>
      %86 = vector.broadcast %85 : vector<8x1xf32> to vector<8x128xf32>
      %87 = arith.subf %78, %86 : vector<8x128xf32>
      %cst_53 = arith.constant 0.000000e+00 : f32
      %88 = vector.broadcast %cst_53 : f32 to vector<8x128xf32>
      %89 = arith.select %81, %87, %88 : vector<8x128xi1>, vector<8x128xf32>
      %90 = arith.mulf %89, %89 : vector<8x128xf32>
      %cst_54 = arith.constant dense<0.000000e+00> : vector<8xf32>
      %91 = vector.multi_reduction <add>, %90, %cst_54 [1] : vector<8x128xf32> to vector<8xf32>
      %92 = vector.shape_cast %91 : vector<8xf32> to vector<8x1xf32>
      %cst_55 = arith.constant 6.250000e-02 : f32
      %93 = vector.broadcast %cst_55 : f32 to vector<8x1xf32>
      %94 = arith.mulf %92, %93 : vector<8x1xf32>
      %cst_56 = arith.constant 9.99999974E-6 : f32
      %95 = vector.broadcast %cst_56 : f32 to vector<8x1xf32>
      %96 = arith.addf %94, %95 : vector<8x1xf32>
      %97 = math.rsqrt %96 : vector<8x1xf32>
      %98 = vector.broadcast %97 : vector<8x1xf32> to vector<8x128xf32>
      %99 = arith.mulf %89, %98 : vector<8x128xf32>
      %100 = vector.broadcast %63 : vector<1x128xf32> to vector<8x128xf32>
      %101 = arith.mulf %99, %100 : vector<8x128xf32>
      %102 = vector.broadcast %64 : vector<1x128xf32> to vector<8x128xf32>
      %103 = arith.addf %101, %102 : vector<8x128xf32>
      %c0_57 = arith.constant 0 : index
      %c0_58 = arith.constant 0 : index
      %104 = vector.load %arg16[%c0_57, %c0_58] : memref<8x128xf32, #tpu.memory_space<vmem>>, vector<8x128xf32>
      tpu.vector_store %arg16[%c0_57, %c0_58], %103 {strides = array<i32>} : memref<8x128xf32, #tpu.memory_space<vmem>>, vector<8x128xf32>,
    } else {
    }
    return
  }
  func.func @transform_0(%arg0: i32, %arg1: i32) -> (i32, i32) {
    %c0_i32 = arith.constant 0 : i32
    return %arg0, %arg1 : i32, i32
  }
  func.func @transform_1(%arg0: i32, %arg1: i32) -> (i32, i32) {
    %c0_i32 = arith.constant 0 : i32
    %c0_i32_0 = arith.constant 0 : i32
    return %arg1, %c0_i32 : i32, i32
  }
  func.func @transform_2(%arg0: i32, %arg1: i32) -> (i32, i32) {
    %c0_i32 = arith.constant 0 : i32
    %c0_i32_0 = arith.constant 0 : i32
    %c0_i32_1 = arith.constant 0 : i32
    return %c0_i32, %c0_i32_0 : i32, i32
  }
  func.func @transform_3(%arg0: i32, %arg1: i32) -> (i32, i32) {
    %c0_i32 = arith.constant 0 : i32
    %c0_i32_0 = arith.constant 0 : i32
    %c0_i32_1 = arith.constant 0 : i32
    return %c0_i32, %c0_i32_0 : i32, i32
  }
  func.func @transform_4(%arg0: i32, %arg1: i32) -> (i32, i32) {
    %c0_i32 = arith.constant 0 : i32
    %c0_i32_0 = arith.constant 0 : i32
    %c0_i32_1 = arith.constant 0 : i32
    return %c0_i32, %c0_i32_0 : i32, i32
  }
  func.func @transform_5(%arg0: i32, %arg1: i32) -> (i32, i32) {
    %c0_i32 = arith.constant 0 : i32
    %c0_i32_0 = arith.constant 0 : i32
    %c0_i32_1 = arith.constant 0 : i32
    return %c0_i32, %c0_i32_0 : i32, i32
  }
  func.func @transform_6(%arg0: i32, %arg1: i32) -> (i32, i32) {
    %c0_i32 = arith.constant 0 : i32
    %c0_i32_0 = arith.constant 0 : i32
    %c0_i32_1 = arith.constant 0 : i32
    return %c0_i32, %c0_i32_0 : i32, i32
  }
  func.func @transform_7(%arg0: i32, %arg1: i32) -> (i32, i32) {
    %c0_i32 = arith.constant 0 : i32
    %c0_i32_0 = arith.constant 0 : i32
    %c0_i32_1 = arith.constant 0 : i32
    return %c0_i32, %c0_i32_0 : i32, i32
  }
  func.func @transform_8(%arg0: i32, %arg1: i32) -> (i32, i32) {
    %c0_i32 = arith.constant 0 : i32
    %c0_i32_0 = arith.constant 0 : i32
    %c0_i32_1 = arith.constant 0 : i32
    return %c0_i32, %c0_i32_0 : i32, i32
  }
  func.func @transform_9(%arg0: i32, %arg1: i32) -> (i32, i32) {
    %c0_i32 = arith.constant 0 : i32
    %c0_i32_0 = arith.constant 0 : i32
    %c0_i32_1 = arith.constant 0 : i32
    return %c0_i32, %c0_i32_0 : i32, i32
  }
  func.func @transform_10(%arg0: i32, %arg1: i32) -> (i32, i32) {
    %c0_i32 = arith.constant 0 : i32
    %c0_i32_0 = arith.constant 0 : i32
    %c0_i32_1 = arith.constant 0 : i32
    return %c0_i32, %c0_i32_0 : i32, i32
  }
  func.func @transform_11(%arg0: i32, %arg1: i32) -> (i32, i32) {
    %c0_i32 = arith.constant 0 : i32
    %c0_i32_0 = arith.constant 0 : i32
    %c0_i32_1 = arith.constant 0 : i32
    return %c0_i32, %c0_i32_0 : i32, i32
  }
  func.func @transform_12(%arg0: i32, %arg1: i32) -> (i32, i32) {
    %c0_i32 = arith.constant 0 : i32
    %c0_i32_0 = arith.constant 0 : i32
    %c0_i32_1 = arith.constant 0 : i32
    return %c0_i32, %c0_i32_0 : i32, i32
  }
  func.func @transform_13(%arg0: i32, %arg1: i32) -> (i32, i32) {
    %c0_i32 = arith.constant 0 : i32
    %c0_i32_0 = arith.constant 0 : i32
    return %arg0, %c0_i32 : i32, i32
  }
  func.func @transform_14(%arg0: i32, %arg1: i32) -> (i32, i32) {
    %c0_i32 = arith.constant 0 : i32
    %c0_i32_0 = arith.constant 0 : i32
    return %arg0, %c0_i32 : i32, i32
  }
}

</mosaic_0001>

<bundles_post_ra>
// kernel: tpu_custom_call.1
= control target key start
LH: loop header
LB: loop body
LE: loop exit
PB: predicated region body
PF: predicated region fallthrough
CT: control target
= control target key end

     0   :  { %20 = vsyncpa [#allocation4], 0  ;;  %s1653_s0 = inlined_call_operand.hbm [shape: f32[8,32], index: 0, kind: input, shape index: {}]   ;;  %s1654_s1 = inlined_call_operand.hbm [shape: f32[32,128], index: 1, kind: input, shape index: {}]   ;;  %s1655_s2 = inlined_call_operand.hbm [shape: f32[1,128], index: 2, kind: input, shape index: {}]   ;;  %s1656_s3 = inlined_call_operand.hbm [shape: f32[128,128], index: 3, kind: input, shape index: {}]   ;;  %s1657_s4 = inlined_call_operand.hbm [shape: f32[1,128], index: 4, kind: input, shape index: {}]   ;;  %s1658_s5 = inlined_call_operand.hbm [shape: f32[1,128], index: 5, kind: input, shape index: {}]   ;;  %s1659_s6 = inlined_call_operand.hbm [shape: f32[1,128], index: 6, kind: input, shape index: {}]   ;;  %s1660_s7 = inlined_call_operand.hbm [shape: f32[128,128], index: 7, kind: input, shape index: {}]   ;;  %s1661_s8 = inlined_call_operand.hbm [shape: f32[1,128], index: 8, kind: input, shape index: {}]   ;;  %s1662_s9 = inlined_call_operand.hbm [shape: f32[128,128], index: 9, kind: input, shape index: {}]   ;;  %s1663_s10 = inlined_call_operand.hbm [shape: f32[1,128], index: 10, kind: input, shape index: {}]   ;;  %s1664_s11 = inlined_call_operand.hbm [shape: f32[1,128], index: 11, kind: input, shape index: {}]   ;;  %s1665_s12 = inlined_call_operand.hbm [shape: f32[1,128], index: 12, kind: input, shape index: {}]   ;;  %s1666_s13 = inlined_call_operand.hbm [shape: f32[8,128], index: 13, kind: output, shape index: {0}]   ;;  %s1667_s14 = inlined_call_operand.hbm [shape: f32[8,128], index: 14, kind: output, shape index: {1}]  }
   0x1   :  { %21 = vsyncpa [#allocation7], 0 }
   0x2   :  { %22 = vsyncpa [#allocation10], 0 }
   0x3   :  { %23 = vsyncpa [#allocation13], 0 }
   0x4   :  { %24 = vsyncpa [#allocation16], 0 }
   0x5   :  { %25 = vsyncpa [#allocation19], 0 }
   0x6   :  { %26 = vsyncpa [#allocation22], 0 }
   0x7   :  { %27 = vsyncpa [#allocation5], 0 }
   0x8   :  { %28 = vsyncpa [#allocation26], 0  ;;  %s1328_s29 = smov [#allocation6]   ;;  %s980_s17 = scalar_lea.hbm %s1654_s1, 512 }
   0x9   :  { %s44_s30 = sshll.u32 %s1328_s29, 4  ;;  %p981_p0 = scmp.ne.s32.totalorder %s1654_s1, %s980_s17  ;;  %s45_s30 = int_to_ptr.vmem [resolvable:$true] %s44_s30 }
   0xa   :  { %p984_p1 = scmp.lt.u32.totalorder %s980_s17, %s1654_s1 }
   0xc   :  { %p986_p2 = pnand %p984_p1, %p981_p0 }
   0xe   :  { %989 = shalt.err (!%p986_p2)
}
   0xf   :  { %s990_s22 = scalar_lea.vmem %s45_s30, 512  ;;  %p995_p4 = scmp.lt.s32.totalorder %s45_s30, %s45_s30 }
  0x10   :  { %p991_p3 = scmp.ne.s32.totalorder %s45_s30, %s990_s22  ;;  %p996_p5 = scmp.lt.s32.totalorder %s990_s22, %s990_s22 }
  0x12   :  { %p997_p6 = por %p996_p5, %p995_p4 }
  0x14   :  { %p998_p7 = pnand %p997_p6, %p991_p3 }
  0x16   :  { %1001 = shalt.err (!%p998_p7)
}
  0x17   :  { %s1329_s23 = smov 128   ;;  %s1330_s24 = smov 8  }
  0x18   :  { %50 = dma.hbm_to_vmem [thread:$0]  %s1654_s1, 512, %s45_s30, [#allocation7], %s1329_s23, %s1329_s23, %s1330_s24  }
  0x19   :  { %s1331_s27 = smov [#allocation9]   ;;  %s1332_s29 = smov [#allocation12]  }
  0x1a   :  { %s66_s28 = sshll.u32 %s1331_s27, 4  ;;  %s89_s15 = sshll.u32 %s1332_s29, 4  ;;  %s67_s28 = int_to_ptr.vmem [resolvable:$true] %s66_s28  ;;  %s90_s15 = int_to_ptr.vmem [resolvable:$true] %s89_s15 }
  0x1b   :  { %s1002_s18 = scalar_lea.hbm %s1656_s3, 2048 }
  0x1c   :  { %p1003_p8 = scmp.ne.s32.totalorder %s1656_s3, %s1002_s18  ;;  %p1006_p9 = scmp.lt.u32.totalorder %s1002_s18, %s1656_s3 }
  0x1e   :  { %p1008_p10 = pnand %p1006_p9, %p1003_p8 }
  0x20   :  { %1011 = shalt.err (!%p1008_p10)
}
  0x21   :  { %s1012_s1 = scalar_lea.vmem %s67_s28, 2048  ;;  %p1017_p12 = scmp.lt.s32.totalorder %s67_s28, %s67_s28 }
  0x22   :  { %p1013_p11 = scmp.ne.s32.totalorder %s67_s28, %s1012_s1  ;;  %p1018_p13 = scmp.lt.s32.totalorder %s1012_s1, %s1012_s1 }
  0x24   :  { %p1019_p0 = por %p1018_p13, %p1017_p12 }
  0x26   :  { %p1020_p1 = pnand %p1019_p0, %p1013_p11 }
  0x28   :  { %1023 = shalt.err (!%p1020_p1)
}
  0x29   :  { %72 = dma.hbm_to_vmem [thread:$0]  %s1656_s3, 2048, %s67_s28, [#allocation10], %s1329_s23, %s1329_s23, %s1330_s24  }
  0x2a   :  { %s1024_s29 = scalar_lea.hbm %s1658_s5, 16 }
  0x2b   :  { %p1025_p2 = scmp.ne.s32.totalorder %s1658_s5, %s1024_s29  ;;  %p1028_p3 = scmp.lt.u32.totalorder %s1024_s29, %s1658_s5 }
  0x2d   :  { %p1030_p4 = pnand %p1028_p3, %p1025_p2 }
  0x2f   :  { %1033 = shalt.err (!%p1030_p4)
}
  0x30   :  { %s1034_s20 = scalar_lea.vmem %s90_s15, 16  ;;  %s1038_s21 = scalar_lea.vmem %s90_s15, 32 }
  0x31   :  { %p1035_p5 = scmp.ne.s32.totalorder %s90_s15, %s1034_s20  ;;  %p1039_p6 = scmp.lt.s32.totalorder %s90_s15, %s90_s15 }
  0x32   :  { %p1040_p7 = scmp.lt.s32.totalorder %s1038_s21, %s1034_s20 }
  0x34   :  { %p1041_p8 = por %p1040_p7, %p1039_p6 }
  0x36   :  { %p1042_p9 = pnand %p1041_p8, %p1035_p5 }
  0x38   :  { %1045 = shalt.err (!%p1042_p9)
}
  0x39   :  { %92 = dma.hbm_to_vmem [thread:$0]  %s1658_s5, 16, %s90_s15, [#allocation13]  }
  0x3a   :  { %s1333_s22 = smov [#allocation15]   ;;  %s1334_s30 = smov [#allocation18]  }
  0x3b   :  { %s108_s1 = sshll.u32 %s1333_s22, 4  ;;  %s130_s25 = sshll.u32 %s1334_s30, 4  ;;  %s109_s1 = int_to_ptr.vmem [resolvable:$true] %s108_s1  ;;  %s131_s25 = int_to_ptr.vmem [resolvable:$true] %s130_s25 }
  0x3c   :  { %s1046_s29 = scalar_lea.hbm %s1660_s7, 2048 }
  0x3d   :  { %p1047_p10 = scmp.ne.s32.totalorder %s1660_s7, %s1046_s29  ;;  %p1050_p11 = scmp.lt.u32.totalorder %s1046_s29, %s1660_s7 }
  0x3f   :  { %p1052_p12 = pnand %p1050_p11, %p1047_p10 }
  0x41   :  { %1055 = shalt.err (!%p1052_p12)
}
  0x42   :  { %s1056_s5 = scalar_lea.vmem %s109_s1, 2048  ;;  %p1061_p0 = scmp.lt.s32.totalorder %s109_s1, %s109_s1 }
  0x43   :  { %p1057_p13 = scmp.ne.s32.totalorder %s109_s1, %s1056_s5  ;;  %p1062_p1 = scmp.lt.s32.totalorder %s1056_s5, %s1056_s5 }
  0x45   :  { %p1063_p2 = por %p1062_p1, %p1061_p0 }
  0x47   :  { %p1064_p3 = pnand %p1063_p2, %p1057_p13 }
  0x49   :  { %1067 = shalt.err (!%p1064_p3)
}
  0x4a   :  { %114 = dma.hbm_to_vmem [thread:$0]  %s1660_s7, 2048, %s109_s1, [#allocation16], %s1329_s23, %s1329_s23, %s1330_s24  }
  0x4b   :  { %s1068_s28 = scalar_lea.hbm %s1662_s9, 2048 }
  0x4c   :  { %p1069_p4 = scmp.ne.s32.totalorder %s1662_s9, %s1068_s28  ;;  %p1072_p5 = scmp.lt.u32.totalorder %s1068_s28, %s1662_s9 }
  0x4e   :  { %p1074_p6 = pnand %p1072_p5, %p1069_p4 }
  0x50   :  { %1077 = shalt.err (!%p1074_p6)
}
  0x51   :  { %s1078_s29 = scalar_lea.vmem %s131_s25, 2048  ;;  %p1083_p8 = scmp.lt.s32.totalorder %s131_s25, %s131_s25 }
  0x52   :  { %p1079_p7 = scmp.ne.s32.totalorder %s131_s25, %s1078_s29  ;;  %p1084_p9 = scmp.lt.s32.totalorder %s1078_s29, %s1078_s29 }
  0x54   :  { %p1085_p10 = por %p1084_p9, %p1083_p8 }
  0x56   :  { %p1086_p11 = pnand %p1085_p10, %p1079_p7 }
  0x58   :  { %1089 = shalt.err (!%p1086_p11)
}
  0x59   :  { %136 = dma.hbm_to_vmem [thread:$0]  %s1662_s9, 2048, %s131_s25, [#allocation19], %s1329_s23, %s1329_s23, %s1330_s24  }
  0x5a   :  { %s1335_s16 = smov [#allocation21]   ;;  %s1336_s18 = smov [#allocation3]  }
  0x5b   :  { %s153_s17 = sshll.u32 %s1335_s16, 4  ;;  %s35_s19 = sshll.u32 %s1336_s18, 4  ;;  %s154_s17 = int_to_ptr.vmem [resolvable:$true] %s153_s17  ;;  %s36_s19 = int_to_ptr.vmem [resolvable:$true] %s35_s19 }
  0x5c   :  { %s1090_s20 = scalar_lea.hbm %s1664_s11, 16 }
  0x5d   :  { %p1091_p12 = scmp.ne.s32.totalorder %s1664_s11, %s1090_s20  ;;  %p1094_p13 = scmp.lt.u32.totalorder %s1090_s20, %s1664_s11 }
  0x5f   :  { %p1096_p0 = pnand %p1094_p13, %p1091_p12 }
  0x61   :  { %1099 = shalt.err (!%p1096_p0)
}
  0x62   :  { %s1100_s9 = scalar_lea.vmem %s154_s17, 16  ;;  %s1104_s23 = scalar_lea.vmem %s154_s17, 32 }
  0x63   :  { %p1101_p1 = scmp.ne.s32.totalorder %s154_s17, %s1100_s9  ;;  %p1105_p2 = scmp.lt.s32.totalorder %s154_s17, %s154_s17 }
  0x64   :  { %p1106_p3 = scmp.lt.s32.totalorder %s1104_s23, %s1100_s9 }
  0x66   :  { %p1107_p4 = por %p1106_p3, %p1105_p2 }
  0x68   :  { %p1108_p5 = pnand %p1107_p4, %p1101_p1 }
  0x6a   :  { %1111 = shalt.err (!%p1108_p5)
}
  0x6b   :  { %156 = dma.hbm_to_vmem [thread:$0]  %s1664_s11, 16, %s154_s17, [#allocation22]  }
  0x6c   :  { %s1112_s27 = scalar_lea.hbm %s1653_s0, 128 }
  0x6d   :  { %p1113_p6 = scmp.ne.s32.totalorder %s1653_s0, %s1112_s27  ;;  %p1116_p7 = scmp.lt.u32.totalorder %s1112_s27, %s1653_s0 }
  0x6f   :  { %p1118_p8 = pnand %p1116_p7, %p1113_p6 }
  0x71   :  { %1121 = shalt.err (!%p1118_p8)
}
  0x72   :  { %s1122_s18 = scalar_lea.vmem %s36_s19, 128  ;;  %p1127_p10 = scmp.lt.s32.totalorder %s36_s19, %s36_s19 }
  0x73   :  { %p1123_p9 = scmp.ne.s32.totalorder %s36_s19, %s1122_s18  ;;  %p1128_p11 = scmp.lt.s32.totalorder %s1122_s18, %s1122_s18 }
  0x75   :  { %p1129_p12 = por %p1128_p11, %p1127_p10 }
  0x77   :  { %p1130_p13 = pnand %p1129_p12, %p1123_p9 }
  0x79   :  { %1133 = shalt.err (!%p1130_p13)
}
  0x7a   :  { %38 = dma.hbm_to_vmem [thread:$0]  %s1653_s0, 128, %s36_s19, [#allocation4]  }
  0x7b   :  { %s1337_s5 = smov [#allocation8]   ;;  %s1338_s20 = smov [#allocation11]  }
  0x7c   :  { %s57_s15 = sshll.u32 %s1337_s5, 4  ;;  %s79_s21 = sshll.u32 %s1338_s20, 4  ;;  %s58_s15 = int_to_ptr.vmem [resolvable:$true] %s57_s15  ;;  %s80_s21 = int_to_ptr.vmem [resolvable:$true] %s79_s21 }
  0x7d   :  { %s1134_s22 = scalar_lea.hbm %s1655_s2, 16 }
  0x7e   :  { %p1135_p0 = scmp.ne.s32.totalorder %s1655_s2, %s1134_s22  ;;  %p1138_p1 = scmp.lt.u32.totalorder %s1134_s22, %s1655_s2 }
  0x80   :  { %p1140_p2 = pnand %p1138_p1, %p1135_p0 }
  0x82   :  { %1143 = shalt.err (!%p1140_p2)
}
  0x83   :  { %s1144_s0 = scalar_lea.vmem %s58_s15, 16  ;;  %s1148_s19 = scalar_lea.vmem %s58_s15, 32 }
  0x84   :  { %p1145_p3 = scmp.ne.s32.totalorder %s58_s15, %s1144_s0  ;;  %p1149_p4 = scmp.lt.s32.totalorder %s58_s15, %s58_s15 }
  0x85   :  { %p1150_p5 = scmp.lt.s32.totalorder %s1148_s19, %s1144_s0 }
  0x87   :  { %p1151_p6 = por %p1150_p5, %p1149_p4 }
  0x89   :  { %p1152_p7 = pnand %p1151_p6, %p1145_p3 }
  0x8b   :  { %1155 = shalt.err (!%p1152_p7)
}
  0x8c   :  { %60 = dma.hbm_to_vmem [thread:$0]  %s1655_s2, 16, %s58_s15, [#allocation7]  }
  0x8d   :  { %s1156_s7 = scalar_lea.hbm %s1657_s4, 16 }
  0x8e   :  { %p1157_p8 = scmp.ne.s32.totalorder %s1657_s4, %s1156_s7  ;;  %p1160_p9 = scmp.lt.u32.totalorder %s1156_s7, %s1657_s4 }
  0x90   :  { %p1162_p10 = pnand %p1160_p9, %p1157_p8 }
  0x92   :  { %1165 = shalt.err (!%p1162_p10)
}
  0x93   :  { %s1166_s17 = scalar_lea.vmem %s80_s21, 16  ;;  %s1170_s5 = scalar_lea.vmem %s80_s21, 32 }
  0x94   :  { %p1167_p11 = scmp.ne.s32.totalorder %s80_s21, %s1166_s17  ;;  %p1171_p12 = scmp.lt.s32.totalorder %s80_s21, %s80_s21 }
  0x95   :  { %p1172_p13 = scmp.lt.s32.totalorder %s1170_s5, %s1166_s17 }
  0x97   :  { %p1173_p0 = por %p1172_p13, %p1171_p12 }
  0x99   :  { %p1174_p1 = pnand %p1173_p0, %p1167_p11 }
  0x9b   :  { %1177 = shalt.err (!%p1174_p1)
}
  0x9c   :  { %82 = dma.hbm_to_vmem [thread:$0]  %s1657_s4, 16, %s80_s21, [#allocation10]  }
  0x9d   :  { %s1339_s20 = smov [#allocation14]   ;;  %s1340_s28 = smov [#allocation17]  }
  0x9e   :  { %s99_s3 = sshll.u32 %s1339_s20, 4  ;;  %s121_s22 = sshll.u32 %s1340_s28, 4  ;;  %s100_s3 = int_to_ptr.vmem [resolvable:$true] %s99_s3  ;;  %s122_s22 = int_to_ptr.vmem [resolvable:$true] %s121_s22 }
  0x9f   :  { %s1178_s24 = scalar_lea.hbm %s1659_s6, 16 }
  0xa0   :  { %p1179_p2 = scmp.ne.s32.totalorder %s1659_s6, %s1178_s24  ;;  %p1182_p3 = scmp.lt.u32.totalorder %s1178_s24, %s1659_s6 }
  0xa2   :  { %p1184_p4 = pnand %p1182_p3, %p1179_p2 }
  0xa4   :  { %1187 = shalt.err (!%p1184_p4)
}
  0xa5   :  { %s1188_s4 = scalar_lea.vmem %s100_s3, 16  ;;  %s1192_s21 = scalar_lea.vmem %s100_s3, 32 }
  0xa6   :  { %p1189_p5 = scmp.ne.s32.totalorder %s100_s3, %s1188_s4  ;;  %p1193_p6 = scmp.lt.s32.totalorder %s100_s3, %s100_s3 }
  0xa7   :  { %p1194_p7 = scmp.lt.s32.totalorder %s1192_s21, %s1188_s4 }
  0xa9   :  { %p1195_p8 = por %p1194_p7, %p1193_p6 }
  0xab   :  { %p1196_p9 = pnand %p1195_p8, %p1189_p5 }
  0xad   :  { %1199 = shalt.err (!%p1196_p9)
}
  0xae   :  { %102 = dma.hbm_to_vmem [thread:$0]  %s1659_s6, 16, %s100_s3, [#allocation13]  }
  0xaf   :  { %s1200_s1 = scalar_lea.hbm %s1661_s8, 16 }
  0xb0   :  { %p1201_p10 = scmp.ne.s32.totalorder %s1661_s8, %s1200_s1  ;;  %p1204_p11 = scmp.lt.u32.totalorder %s1200_s1, %s1661_s8 }
  0xb2   :  { %p1206_p12 = pnand %p1204_p11, %p1201_p10 }
  0xb4   :  { %1209 = shalt.err (!%p1206_p12)
}
  0xb5   :  { %s1210_s5 = scalar_lea.vmem %s122_s22, 16  ;;  %s1214_s2 = scalar_lea.vmem %s122_s22, 32 }
  0xb6   :  { %p1211_p13 = scmp.ne.s32.totalorder %s122_s22, %s1210_s5  ;;  %p1215_p0 = scmp.lt.s32.totalorder %s122_s22, %s122_s22 }
  0xb7   :  { %p1216_p1 = scmp.lt.s32.totalorder %s1214_s2, %s1210_s5 }
  0xb9   :  { %p1217_p2 = por %p1216_p1, %p1215_p0 }
  0xbb   :  { %p1218_p3 = pnand %p1217_p2, %p1211_p13 }
  0xbd   :  { %1221 = shalt.err (!%p1218_p3)
}
  0xbe   :  { %124 = dma.hbm_to_vmem [thread:$0]  %s1661_s8, 16, %s122_s22, [#allocation16]  }
  0xbf   :  { %s1341_s20 = smov [#allocation20]   ;;  %s1342_s28 = smov [#allocation23]  }
  0xc0   :  { %s143_s3 = sshll.u32 %s1341_s20, 4  ;;  %s163_s9 = sshll.u32 %s1342_s28, 4  ;;  %s144_s3 = int_to_ptr.vmem [resolvable:$true] %s143_s3  ;;  %s164_s9 = int_to_ptr.vmem [resolvable:$true] %s163_s9 }
  0xc1   :  { %s1222_s25 = scalar_lea.hbm %s1663_s10, 16 }
  0xc2   :  { %p1223_p4 = scmp.ne.s32.totalorder %s1663_s10, %s1222_s25  ;;  %p1226_p5 = scmp.lt.u32.totalorder %s1222_s25, %s1663_s10 }
  0xc4   :  { %p1228_p6 = pnand %p1226_p5, %p1223_p4 }
  0xc6   :  { %1231 = shalt.err (!%p1228_p6)
}
  0xc7   :  { %s1232_s8 = scalar_lea.vmem %s144_s3, 16  ;;  %s1236_s22 = scalar_lea.vmem %s144_s3, 32 }
  0xc8   :  { %p1233_p7 = scmp.ne.s32.totalorder %s144_s3, %s1232_s8  ;;  %p1237_p8 = scmp.lt.s32.totalorder %s144_s3, %s144_s3 }
  0xc9   :  { %p1238_p9 = scmp.lt.s32.totalorder %s1236_s22, %s1232_s8 }
  0xcb   :  { %p1239_p10 = por %p1238_p9, %p1237_p8 }
  0xcd   :  { %p1240_p11 = pnand %p1239_p10, %p1233_p7 }
  0xcf   :  { %1243 = shalt.err (!%p1240_p11)
}
  0xd0   :  { %146 = dma.hbm_to_vmem [thread:$0]  %s1663_s10, 16, %s144_s3, [#allocation19]  }
  0xd1   :  { %s1244_s7 = scalar_lea.hbm %s1665_s12, 16 }
  0xd2   :  { %p1245_p12 = scmp.ne.s32.totalorder %s1665_s12, %s1244_s7  ;;  %p1248_p13 = scmp.lt.u32.totalorder %s1244_s7, %s1665_s12 }
  0xd4   :  { %p1250_p0 = pnand %p1248_p13, %p1245_p12 }
  0xd6   :  { %1253 = shalt.err (!%p1250_p0)
}
  0xd7   :  { %s1254_s17 = scalar_lea.vmem %s164_s9, 16  ;;  %s1258_s5 = scalar_lea.vmem %s164_s9, 32 }
  0xd8   :  { %p1255_p1 = scmp.ne.s32.totalorder %s164_s9, %s1254_s17  ;;  %p1259_p2 = scmp.lt.s32.totalorder %s164_s9, %s164_s9 }
  0xd9   :  { %p1260_p3 = scmp.lt.s32.totalorder %s1258_s5, %s1254_s17 }
  0xdb   :  { %p1261_p4 = por %p1260_p3, %p1259_p2 }
  0xdd   :  { %p1262_p5 = pnand %p1261_p4, %p1255_p1 }
  0xdf   :  { %1265 = shalt.err (!%p1262_p5)
}
  0xe0   :  { %166 = dma.hbm_to_vmem [thread:$0]  %s1665_s12, 16, %s164_s9, [#allocation22]  }
  0xe1   :  { %1310 = dma.done.wait [#allocation4], 128  }
  0xe2   :  { %1311 = vsyncadd [#allocation4], 4294967168 }
  0xe3   :  { %1312 = dma.done.wait [#allocation7], 528  }
  0xe4   :  { %1313 = vsyncadd [#allocation7], 4294966768 }
  0xe5   :  { %1314 = dma.done.wait [#allocation10], 2064  }
  0xe6   :  { %1315 = vsyncadd [#allocation10], 4294965232 }
  0xe7   :  { %1316 = dma.done.wait [#allocation13], 32  }
  0xe8   :  { %1317 = vsyncadd [#allocation13], 4294967264 }
  0xe9   :  { %1318 = dma.done.wait [#allocation16], 2064  }
  0xea   :  { %1319 = vsyncadd [#allocation16], 4294965232 }
  0xeb   :  { %1320 = dma.done.wait [#allocation19], 2064  }
  0xec   :  { %1321 = vsyncadd [#allocation19], 4294965232 }
  0xed   :  { %1322 = dma.done.wait [#allocation22], 32  }
  0xee   :  { %1323 = vsyncadd [#allocation22], 4294967264  ;;  %v1343_v0 = vmov 0.0|0.0   ;;  %vm1344_vm0 = vmmov 0   ;;  %v1345_v1 = vmov 0.0   ;;  %v213_v2 = vld [vmem:[#allocation6] sm:$0xff]  ;;  %v406_v56 = vlaneseq }
  0xef   :  { %874 = vmatprep.subr.bf16.mxu0 %v1343_v0  ;;  %766 = vmatprep.mubr.msk.f32.mxu0 %vm1344_vm0, %v1345_v1  ;;  %v214_v3 = vld [vmem:[#allocation6 + $0x8] sm:$0xff]  ;;  %v215_v4 = vld [vmem:[#allocation6 + $0x10] sm:$0xff]  ;;  %v216_v6 = vld [vmem:[#allocation6 + $0x18] sm:$0xff]  ;;  %vm217_vm1 = vcmask 261120   ;;  %s1346_s12 = smov [#allocation24]  }
  0xf0   :  { %880 = vmatprep.subr.bf16.mxu1 %v1343_v0  ;;  %801 = vmatprep.mubr.msk.f32.mxu1 %vm1344_vm0, %v1345_v1  ;;  %v875_v5 = vpack.c.bf16 %v214_v3, %v213_v2  ;;  %v298_v7 = vld [vmem:[#allocation9] sm:$0xff]  ;;  %v299_v8 = vld [vmem:[#allocation9 + $0x8] sm:$0xff]  ;;  %v300_v9 = vld [vmem:[#allocation9 + $0x10] sm:$0xff]  ;;  %v878_v11 = vpack.c.bf16 %v216_v6, %v215_v4  ;;  %v1614_v57 = vand.u32 127, %v406_v56  ;;  %s664_s6 = sshll.u32 %s1346_s12, 4  ;;  %s665_s6 = int_to_ptr.vmem [resolvable:$true] %s664_s6 }
  0xf1   :  { %v301_v10 = vld [vmem:[#allocation9 + $0x18] sm:$0xff]  ;;  %v881_v12 = vpack.c.bf16 %v299_v8, %v298_v7  ;;  %v302_v14 = vld [vmem:[#allocation9 + $0x20] sm:$0xff]  ;;  %v303_v15 = vld [vmem:[#allocation9 + $0x28] sm:$0xff]  ;;  %s1266_s15 = scalar_lea.vmem %s665_s6, 128  ;;  %p1271_p7 = scmp.lt.s32.totalorder %s665_s6, %s665_s6 }
  0xf2   :  { %876 = vmatpush3.bf16.msra.mxu0 %v875_v5  ;;  %v884_v13 = vpack.c.bf16 %v301_v10, %v300_v9  ;;  %v212_v16 = vld [vmem:[#allocation3] sm:$0xff]  ;;  %v887_v17 = vpack.c.bf16 %v303_v15, %v302_v14  ;;  %v306_v21 = vld [vmem:[#allocation9 + $0x40] sm:$0xff]  ;;  %v307_v22 = vld [vmem:[#allocation9 + $0x48] sm:$0xff]  ;;  %vm408_vm2 = vcmp.lt.s32.totalorder %v1614_v57, 64  ;;  %vm630_vm3 = vcmp.lt.s32.totalorder %v1614_v57, 16  ;;  %p1267_p6 = scmp.ne.s32.totalorder %s665_s6, %s1266_s15  ;;  %p1272_p8 = scmp.lt.s32.totalorder %s1266_s15, %s1266_s15 }
  0xf3   :  { %877 = vmatprep.subr.bf16.mxu0 %v1343_v0  ;;  %882 = vmatpush3.bf16.msra.mxu1 %v881_v12  ;;  %v304_v18 = vld [vmem:[#allocation9 + $0x30] sm:$0xff]  ;;  %v305_v19 = vld [vmem:[#allocation9 + $0x38] sm:$0xff]  ;;  %v893_v23 = vpack.c.bf16 %v307_v22, %v306_v21  ;;  %v310_v27 = vld [vmem:[#allocation9 + $0x60] sm:$0xff] }
  0xf4   :  { %883 = vmatprep.subr.bf16.mxu1 %v1343_v0  ;;  %v890_v20 = vpack.c.bf16 %v305_v19, %v304_v18  ;;  %v308_v24 = vld [vmem:[#allocation9 + $0x50] sm:$0xff]  ;;  %v309_v25 = vld [vmem:[#allocation9 + $0x58] sm:$0xff]  ;;  %v311_v28 = vld [vmem:[#allocation9 + $0x68] sm:$0xff]  ;;  %p1273_p9 = por %p1272_p8, %p1271_p7 }
  0xf5   :  { %v896_v26 = vpack.c.bf16 %v309_v25, %v308_v24  ;;  %v899_v29 = vpack.c.bf16 %v311_v28, %v310_v27  ;;  %v312_v30 = vld [vmem:[#allocation9 + $0x70] sm:$0xff]  ;;  %v313_v31 = vld [vmem:[#allocation9 + $0x78] sm:$0xff]  ;;  %v695_v42 = vld [vmem:[#allocation11] ss:$0 sm:$0xff] }
  0xf6   :  { %879 = vmatpush3.bf16.msra.mxu0 %v878_v11  ;;  %v902_v32 = vpack.c.bf16 %v313_v31, %v312_v30  ;;  %v694_v33 = vld [vmem:[#allocation8] ss:$0 sm:$0xff]  ;;  %v436_v47 = vld [vmem:[#allocation15] sm:$0xff]  ;;  %v437_v48 = vld [vmem:[#allocation15 + $0x8] sm:$0xff]  ;;  %p1274_p10 = pnand %p1273_p9, %p1267_p6 }
  0xf7   :  { %904 = vmatprep.subr.bf16.mxu0 %v1343_v0  ;;  %885 = vmatpush3.bf16.msra.mxu1 %v884_v13  ;;  %v438_v49 = vld [vmem:[#allocation15 + $0x10] sm:$0xff]  ;;  %v905_v50 = vpack.c.bf16 %v437_v48, %v436_v47  ;;  %v439_v51 = vld [vmem:[#allocation15 + $0x18] sm:$0xff]  ;;  %v440_v53 = vld [vmem:[#allocation15 + $0x20] sm:$0xff] }
  0xf8   :  { %886 = vmatprep.subr.bf16.mxu1 %v1343_v0  ;;  %v908_v52 = vpack.c.bf16 %v439_v51, %v438_v49  ;;  %v441_v54 = vld [vmem:[#allocation15 + $0x28] sm:$0xff]  ;;  %v442_v63 = vld [vmem:[#allocation15 + $0x30] sm:$0xff]  ;;  %v444_v3 = vld [vmem:[#allocation15 + $0x40] sm:$0xff] }
  0xf9   :  { %767 = vmatmul.mubr.msk.f32.vlgmr.msra.gmra.mrb[0].mxu0 %vm217_vm1, %v212_v16  ;;  %v911_v55 = vpack.c.bf16 %v441_v54, %v440_v53  ;;  %v445_v4 = vld [vmem:[#allocation15 + $0x48] sm:$0xff]  ;;  %v446_v6 = vld [vmem:[#allocation15 + $0x50] sm:$0xff]  ;;  %v447_v7 = vld [vmem:[#allocation15 + $0x58] sm:$0xff] }
  0xfa   :  { %836 = vmatprep.mubr.msk.f32.mxu0 %vm1344_vm0, %v1345_v1  ;;  %906 = vmatpush3.bf16.msra.mxu0 %v905_v50  ;;  %v917_v5 = vpack.c.bf16 %v445_v4, %v444_v3  ;;  %v920_v8 = vpack.c.bf16 %v447_v7, %v446_v6  ;;  %v448_v9 = vld [vmem:[#allocation15 + $0x60] sm:$0xff]  ;;  %v449_v10 = vld [vmem:[#allocation15 + $0x68] sm:$0xff]  ;;  %v450_v12 = vld [vmem:[#allocation15 + $0x70] sm:$0xff] }
  0xfb   :  { %888 = vmatpush3.bf16.msra.mxu1 %v887_v17  ;;  %907 = vmatprep.subr.bf16.mxu0 %v1343_v0  ;;  %v923_v11 = vpack.c.bf16 %v449_v10, %v448_v9  ;;  %v451_v13 = vld [vmem:[#allocation15 + $0x78] sm:$0xff]  ;;  %v453_v15 = vld [vmem:[#allocation18] sm:$0xff]  ;;  %v454_v16 = vld [vmem:[#allocation18 + $0x8] sm:$0xff] }
  0xfc   :  { %889 = vmatprep.subr.bf16.mxu1 %v1343_v0  ;;  %v926_v14 = vpack.c.bf16 %v451_v13, %v450_v12  ;;  %v455_v17 = vld [vmem:[#allocation18 + $0x10] sm:$0xff]  ;;  %v929_v18 = vpack.c.bf16 %v454_v16, %v453_v15  ;;  %v456_v19 = vld [vmem:[#allocation18 + $0x18] sm:$0xff]  ;;  %v457_v21 = vld [vmem:[#allocation18 + $0x20] sm:$0xff] }
  0xfd   :  { %v458_v22 = vld [vmem:[#allocation18 + $0x28] sm:$0xff]  ;;  %v696_v28 = vld [vmem:[#allocation12] ss:$0 sm:$0xff]  ;;  %v697_v30 = vld [vmem:[#allocation14] ss:$0 sm:$0xff] }
  0xfe   :  { %909 = vmatpush3.bf16.msra.mxu0 %v908_v52  ;;  %v698_v48 = vld [vmem:[#allocation17] ss:$0 sm:$0xff] }
  0xff   :  { %891 = vmatpush3.bf16.msra.mxu1 %v890_v20  ;;  %910 = vmatprep.subr.bf16.mxu0 %v1343_v0  ;;  %v932_v20 = vpack.c.bf16 %v456_v19, %v455_v17 }
 0x100   :  { %892 = vmatprep.subr.bf16.mxu1 %v1343_v0 }
 0x102   :  { %912 = vmatpush3.bf16.msra.mxu0 %v911_v55 }
 0x103   :  { %894 = vmatpush3.bf16.msra.mxu1 %v893_v23  ;;  %913 = vmatprep.subr.bf16.mxu0 %v1343_v0  ;;  %v935_v23 = vpack.c.bf16 %v458_v22, %v457_v21 }
 0x104   :  { %895 = vmatprep.subr.bf16.mxu1 %v1343_v0 }
 0x107   :  { %897 = vmatpush3.bf16.msra.mxu1 %v896_v26 }
 0x108   :  { %898 = vmatprep.subr.bf16.mxu1 %v1343_v0 }
 0x10b   :  { %900 = vmatpush3.bf16.msra.mxu1 %v899_v29 }
 0x10c   :  { %901 = vmatprep.subr.bf16.mxu1 %v1343_v0 }
 0x10f   :  { %903 = vmatpush3.bf16.msra.mxu1 %v902_v32 }
 0x110   :  { %928 = vmatprep.subr.bf16.mxu1 %v1343_v0 }
 0x1cc   :  { %v287_v34 = vpop.f32.mrb[0].mxu0 }
 0x1cd   :  { %v323_v35 = vadd.f32 %v694_v33, %v287_v34  ;;  %v768_v36 = vpop.f32.mrb[1].mxu0  ;;  %v459_v33 = vld [vmem:[#allocation18 + $0x30] sm:$0xff]  ;;  %v460_v34 = vld [vmem:[#allocation18 + $0x38] sm:$0xff] }
 0x1ce   :  { %v461_v36 = vld [vmem:[#allocation18 + $0x40] sm:$0xff] }
 0x1cf   :  { %v325_v37 = vmul.f32 0.70710677, %v323_v35  ;;  %v324_v39 = vmul.f32 0.5, %v323_v35 }
 0x1d1   :  { %972 = verf.f32 %v325_v37  ;;  %v462_v37 = vld [vmem:[#allocation18 + $0x48] sm:$0xff] }
 0x1db   :  { %v973_v38 = vpop.eup %972 }
 0x1dc   :  { %v327_v40 = vadd.f32 1.0, %v973_v38  ;;  %v941_v38 = vpack.c.bf16 %v462_v37, %v461_v36 }
 0x1de   :  { %v328_v41 = vmul.f32 %v327_v40, %v324_v39  ;;  %v463_v39 = vld [vmem:[#allocation18 + $0x50] sm:$0xff]  ;;  %v464_v40 = vld [vmem:[#allocation18 + $0x58] sm:$0xff] }
 0x1e0   :  { %802 = vmatmul.mubr.f32.vlgmr.msra.gmra.mrb[0].mxu1 %v328_v41  ;;  %v944_v41 = vpack.c.bf16 %v464_v40, %v463_v39 }
 0x1e1   :  { %871 = vmatprep.mubr.msk.f32.mxu1 %vm1344_vm0, %v1345_v1  ;;  %v443_v1 = vld [vmem:[#allocation15 + $0x38] sm:$0xff]  ;;  %930 = vmatpush3.bf16.msra.mxu1 %v929_v18 }
 0x1e2   :  { %v914_v2 = vpack.c.bf16 %v443_v1, %v442_v63  ;;  %931 = vmatprep.subr.bf16.mxu1 %v1343_v0 }
 0x1e4   :  { %915 = vmatpush3.bf16.msra.mxu0 %v914_v2 }
 0x1e5   :  { %916 = vmatprep.subr.bf16.mxu0 %v1343_v0  ;;  %933 = vmatpush3.bf16.msra.mxu1 %v932_v20 }
 0x1e6   :  { %934 = vmatprep.subr.bf16.mxu1 %v1343_v0 }
 0x1e8   :  { %918 = vmatpush3.bf16.msra.mxu0 %v917_v5 }
 0x1e9   :  { %919 = vmatprep.subr.bf16.mxu0 %v1343_v0  ;;  %936 = vmatpush3.bf16.msra.mxu1 %v935_v23 }
 0x1ea   :  { %937 = vmatprep.subr.bf16.mxu1 %v1343_v0 }
 0x1ec   :  { %921 = vmatpush3.bf16.msra.mxu0 %v920_v8 }
 0x1ed   :  { %922 = vmatprep.subr.bf16.mxu0 %v1343_v0 }
 0x1f0   :  { %924 = vmatpush3.bf16.msra.mxu0 %v923_v11 }
 0x1f1   :  { %925 = vmatprep.subr.bf16.mxu0 %v1343_v0 }
 0x1f4   :  { %927 = vmatpush3.bf16.msra.mxu0 %v926_v14 }
 0x2b3   :  { %v401_v43 = vpop.f32.mrb[0].mxu1 }
 0x2b4   :  { %v402_v44 = vadd.f32 %v695_v42, %v401_v43  ;;  %v803_v45 = vpop.f32.mrb[1].mxu1  ;;  %v465_v42 = vld [vmem:[#allocation18 + $0x60] sm:$0xff]  ;;  %v466_v43 = vld [vmem:[#allocation18 + $0x68] sm:$0xff] }
 0x2b5   :  { %v467_v45 = vld [vmem:[#allocation18 + $0x70] sm:$0xff] }
 0x2b6   :  { %v405_v46 = vadd.f32 %v402_v44, %v323_v35  ;;  %v938_v35 = vpack.c.bf16 %v460_v34, %v459_v33  ;;  %v947_v44 = vpack.c.bf16 %v466_v43, %v465_v42 }
 0x2b8   :  { %409 = vadd.xlane.f32.xlu0 %v405_v46  ;;  %939 = vmatpush3.bf16.msra.mxu1 %v938_v35 }
 0x2b9   :  { %940 = vmatprep.subr.bf16.mxu1 %v1343_v0 }
 0x2bc   :  { %942 = vmatpush3.bf16.msra.mxu1 %v941_v38 }
 0x2bd   :  { %943 = vmatprep.subr.bf16.mxu1 %v1343_v0 }
 0x2c0   :  { %945 = vmatpush3.bf16.msra.mxu1 %v944_v41 }
 0x2c1   :  { %946 = vmatprep.subr.bf16.mxu1 %v1343_v0 }
 0x2c4   :  { %948 = vmatpush3.bf16.msra.mxu1 %v947_v44 }
 0x2c5   :  { %949 = vmatprep.subr.bf16.mxu1 %v1343_v0 }
 0x345   :  { %v410_v58 = vpop.xlane.xlu0 %409 }
 0x346   :  { %v411_v59 = vmul.f32 0.015625, %v410_v58  ;;  %v699_v58 = vld [vmem:[#allocation20] ss:$0 sm:$0xff] }
 0x348   :  { %v412_v60 = vsub.f32 %v405_v46, %v411_v59  ;;  %v468_v46 = vld [vmem:[#allocation18 + $0x78] sm:$0xff] }
 0x349   :  { %v950_v47 = vpack.c.bf16 %v468_v46, %v467_v45 }
 0x34a   :  { %v413_v61 = vsel %vm408_vm2, %v412_v60, 0.0 }
 0x34b   :  { %v414_v62 = vmul.f32 %v413_v61, %v413_v61  ;;  %951 = vmatpush3.bf16.msra.mxu1 %v950_v47 }
 0x34d   :  { %415 = vadd.xlane.f32.xlu0 %v414_v62 }
 0x3da   :  { %v416_v24 = vpop.xlane.xlu0 %415 }
 0x3db   :  { %v417_v25 = vmul.f32 0.015625, %v416_v24 }
 0x3dd   :  { %v418_v26 = vadd.f32 1e-05, %v417_v25 }
 0x3df   :  { %974 = vrsqrt.f32 %v418_v26 }
 0x3e9   :  { %v975_v27 = vpop.eup %974 }
 0x3ea   :  { %v420_v29 = vmul.f32 %v975_v27, %v413_v61 }
 0x3ec   :  { %v427_v31 = vmul.f32 %v696_v28, %v420_v29 }
 0x3ee   :  { %v434_v32 = vadd.f32 %v697_v30, %v427_v31 }
 0x3f0   :  { %837 = vmatmul.mubr.f32.vlgmr.msra.gmra.mrb[2].mxu0 %v434_v32  ;;  %435 = vst [vmem:[#allocation24] sm:$0xff] %v434_v32 }
 0x4c3   :  { %v544_v49 = vpop.f32.mrb[2].mxu0 }
 0x4c4   :  { %v545_v50 = vadd.f32 %v698_v48, %v544_v49  ;;  %v838_v51 = vpop.f32.mrb[3].mxu0 }
 0x4c6   :  { %v549_v52 = vmul.f32 0.70710677, %v545_v50  ;;  %v548_v54 = vmul.f32 0.5, %v545_v50 }
 0x4c8   :  { %976 = verf.f32 %v549_v52 }
 0x4d2   :  { %v977_v53 = vpop.eup %976 }
 0x4d3   :  { %v551_v55 = vadd.f32 1.0, %v977_v53 }
 0x4d5   :  { %v552_v56 = vmul.f32 %v551_v55, %v548_v54 }
 0x4d7   :  { %872 = vmatmul.mubr.f32.vlgmr.msra.gmra.mrb[2].mxu1 %v552_v56 }
 0x5aa   :  { %v625_v59 = vpop.f32.mrb[2].mxu1 }
 0x5ab   :  { %v626_v60 = vadd.f32 %v699_v58, %v625_v59  ;;  %v873_v61 = vpop.f32.mrb[3].mxu1 }
 0x5ad   :  { %v629_v0 = vadd.f32 %v626_v60, %v545_v50 }
 0x5af   :  { %631 = vadd.xlane.f32.xlu1 %v629_v0 }
 0x63c   :  { %v632_v62 = vpop.xlane.xlu1 %631 }
 0x63d   :  { %v633_v63 = vmul.f32 0.0625, %v632_v62 }
 0x63f   :  { %v634_v1 = vsub.f32 %v629_v0, %v633_v63 }
 0x641   :  { %v635_v2 = vsel %vm630_vm3, %v634_v1, 0.0 }
 0x642   :  { %v636_v3 = vmul.f32 %v635_v2, %v635_v2 }
 0x644   :  { %637 = vadd.xlane.f32.xlu1 %v636_v3 }
 0x645   :  { %1277 = shalt.err (!%p1274_p10)
}
 0x646   :  { %s1278_s28 = scalar_lea.hbm %s1666_s13, 128 }
 0x647   :  { %p1279_p11 = scmp.ne.s32.totalorder %s1666_s13, %s1278_s28  ;;  %p1282_p12 = scmp.lt.u32.totalorder %s1278_s28, %s1666_s13 }
 0x649   :  { %p1284_p13 = pnand %p1282_p12, %p1279_p11 }
 0x64b   :  { %1287 = shalt.err (!%p1284_p13)
}
 0x64c   :  { %667 = dma.vmem_to_hbm [thread:$0]  %s665_s6, 128, %s1666_s13, [#allocation5]   ;;  %v700_v7 = vld [vmem:[#allocation21] ss:$0 sm:$0xff]  ;;  %v701_v9 = vld [vmem:[#allocation23] ss:$0 sm:$0xff] }
 0x64d   :  { %s1347_s30 = smov [#allocation25]  }
 0x64e   :  { %s674_s4 = sshll.u32 %s1347_s30, 4  ;;  %s675_s4 = int_to_ptr.vmem [resolvable:$true] %s674_s4 }
 0x64f   :  { %s1288_s8 = scalar_lea.vmem %s675_s4, 128  ;;  %p1293_p1 = scmp.lt.s32.totalorder %s675_s4, %s675_s4 }
 0x650   :  { %p1289_p0 = scmp.ne.s32.totalorder %s675_s4, %s1288_s8  ;;  %p1294_p2 = scmp.lt.s32.totalorder %s1288_s8, %s1288_s8 }
 0x652   :  { %p1295_p3 = por %p1294_p2, %p1293_p1 }
 0x654   :  { %p1296_p4 = pnand %p1295_p3, %p1289_p0 }
 0x6d1   :  { %v638_v57 = vpop.xlane.xlu1 %637 }
 0x6d2   :  { %v639_v4 = vmul.f32 0.0625, %v638_v57 }
 0x6d4   :  { %v640_v5 = vadd.f32 1e-05, %v639_v4 }
 0x6d6   :  { %978 = vrsqrt.f32 %v640_v5 }
 0x6e0   :  { %v979_v6 = vpop.eup %978 }
 0x6e1   :  { %v642_v8 = vmul.f32 %v979_v6, %v635_v2 }
 0x6e3   :  { %v649_v10 = vmul.f32 %v700_v7, %v642_v8 }
 0x6e5   :  { %v656_v11 = vadd.f32 %v701_v9, %v649_v10 }
 0x6e7   :  { %657 = vst [vmem:[#allocation25] sm:$0xff] %v656_v11 }
 0x6e8   :  { %1299 = shalt.err (!%p1296_p4)
}
 0x6e9   :  { %s1300_s21 = scalar_lea.hbm %s1667_s14, 128 }
 0x6ea   :  { %p1301_p5 = scmp.ne.s32.totalorder %s1667_s14, %s1300_s21  ;;  %p1304_p6 = scmp.lt.u32.totalorder %s1300_s21, %s1667_s14 }
 0x6ec   :  { %p1306_p7 = pnand %p1304_p6, %p1301_p5 }
 0x6ee   :  { %1309 = shalt.err (!%p1306_p7)
}
 0x6ef   :  { %677 = dma.vmem_to_hbm [thread:$0]  %s675_s4, 128, %s1667_s14, [#allocation26]  }
 0x6f0   :  { %1324 = dma.done.wait [#allocation5], 128  }
 0x6f1   :  { %1325 = vsyncadd [#allocation5], 4294967168 }
 0x6f2   :  { %1326 = dma.done.wait [#allocation26], 128  }
 0x6f3   :  { %1327 = vsyncadd [#allocation26], 4294967168 }
 0x6f4   :  { %684 = vsyncpa [#allocation4], 1 }
 0x6f5   :  { %685 = vsyncpa [#allocation7], 1 }
 0x6f6   :  { %686 = vsyncpa [#allocation10], 1 }
 0x6f7   :  { %687 = vsyncpa [#allocation13], 1 }
 0x6f8   :  { %688 = vsyncpa [#allocation16], 1 }
 0x6f9   :  { %689 = vsyncpa [#allocation19], 1 }
 0x6fa   :  { %690 = vsyncpa [#allocation22], 1 }
 0x6fb   :  { %691 = vsyncpa [#allocation5], 1 }
 0x6fc   :  { %692 = vsyncpa [#allocation26], 1 }

</bundles_post_ra>
